<compile_context>
chip_gen: v5e
topology: v5e:2x2
jax: 0.10.0
libtpu: 0.0.40
codegen_flags: <defaults>
</compile_context>

<pallas_src>
import numpy as np
import jax
import jax.numpy as jnp
from jax import lax
from jax.experimental import pallas as pl
from jax.experimental.pallas import tpu as pltpu


NEG_INF_PAD = -1e30          # additive bias for padded rows/cols
LABEL_BIAS = -1000000.0      # matches the PyTorch criterion constant
MATMUL_DTYPE = jnp.float32   # set to jnp.bfloat16 for ~2-4x MXU throughput
                             # (loosen the netout/loss tolerances if you do)


def _round_up(x, m):
    return ((x + m - 1) // m) * m


def _pick_tq(n_pad):
    # Biggest row tile that still gives >=2 pipelined grid steps; keeps live
    # VMEM at O(tq * n_pad) (v7x 64 MiB friendly) and exercises accumulation.
    for tq in (256, 128, 64):
        if n_pad % tq == 0 and n_pad // tq >= 2:
            return tq
    return n_pad


def _encode(e, w_t, b):
    # PyTorch Linear: y = e @ W^T + b.  W^T is pre-transposed once in the
    # wrapper, so this is a straight MXU matmul (no in-kernel transpose) + ReLU.
    y = jnp.dot(e.astype(MATMUL_DTYPE), w_t.astype(MATMUL_DTYPE),
                preferred_element_type=jnp.float32) + b
    return jnp.maximum(y, 0.0)


# ----------------------------------------------------------------------------
# Kernel A: both encoders fused into a single call (HGNN.forward)
# ----------------------------------------------------------------------------
def dual_encoder_kernel(eu_ref, ev_ref, wut_ref, bu_ref, wvt_ref, bv_ref,
                        xu_ref, xv_ref):
    xu_ref[...] = _encode(eu_ref[...], wut_ref[...], bu_ref[...])
    xv_ref[...] = _encode(ev_ref[...], wvt_ref[...], bv_ref[...])


def run_forward(eu, ev, w_u_t, b_u, w_v_t, b_v):
    n_u, d = eu.shape
    n_v = ev.shape[0]
    vmem = pl.BlockSpec(memory_space=pltpu.MemorySpace.VMEM)
    return pl.pallas_call(
        dual_encoder_kernel,
        out_shape=(jax.ShapeDtypeStruct((n_u, d), jnp.float32),
                   jax.ShapeDtypeStruct((n_v, d), jnp.float32)),
        in_specs=[vmem] * 6,
        out_specs=(vmem, vmem),
        compiler_params=pltpu.CompilerParams(vmem_limit_bytes=32 << 20),
    )(eu, ev, w_u_t, b_u.reshape(1, d), w_v_t, b_v.reshape(1, d))


# ----------------------------------------------------------------------------
# Kernel B: fused loss path, tiled over query-row blocks.
#   step i:  x_u tile  = ReLU(eu_tile @ WuT + bu)                (MXU + VPU)
#            netout    = x_u_tile @ x_v^T     (trans_b via dot_general, MXU)
#            score     = netout * scale + bias_tile   (bias pre-folded in HBM)
#            row-direction log-softmax diag finished per tile;
#            column direction accumulated flash-style (online max/sum) and
#            finalized under pl.when on the last step.
# ----------------------------------------------------------------------------
def hgnn_loss_kernel(eu_ref, ev_ref, wut_ref, bu_ref, wvt_ref, bv_ref,
                     bias_ref, wrow_ref, wcol_ref, scale_ref,
                     netout_ref, loss_ref,
                     xv_ref, mcol_ref, scol_ref, dcol_ref, racc_ref):
    i = pl.program_id(0)
    tq, n_pad = bias_ref.shape

    @pl.when(i == 0)
    def _init():
        # x_v is needed by every row tile: encode once, keep resident in VMEM.
        xv_ref[...] = _encode(ev_ref[...], wvt_ref[...], bv_ref[...])
        mcol_ref[...] = jnp.full(mcol_ref.shape, -jnp.inf, jnp.float32)
        scol_ref[...] = jnp.zeros(scol_ref.shape, jnp.float32)
        dcol_ref[...] = jnp.zeros(dcol_ref.shape, jnp.float32)
        racc_ref[...] = jnp.zeros(racc_ref.shape, jnp.float32)

    # encoder for this row tile (stays in vregs, never round-trips to HBM)
    xu = _encode(eu_ref[...], wut_ref[...], bu_ref[...])
    xv = xv_ref[...]

    # similarity tile: contract last dims -> MXU trans_b, no XLU transpose
    netout = lax.dot_general(xu.astype(MATMUL_DTYPE), xv.astype(MATMUL_DTYPE),
                             (((1,), (1,)), ((), ())),
                             preferred_element_type=jnp.float32)
    netout_ref[...] = netout

    # bias already holds (labels - I) * -1e6 and the -1e30 pad fill
    score = netout * scale_ref[0, 0] + bias_ref[...]

    # diagonal entries owned by this row tile (global row r sits at column r)
    rows = lax.broadcasted_iota(jnp.int32, (tq, n_pad), 0) + i * tq
    cols = lax.broadcasted_iota(jnp.int32, (tq, n_pad), 1)
    diag_sel = jnp.where(rows == cols, score, 0.0)
    diag_row = jnp.sum(diag_sel, axis=1, keepdims=True)           # (tq, 1)
    dcol_ref[...] += jnp.sum(diag_sel, axis=0, keepdims=True)     # (1, n_pad)

    # row-direction ("pocket") log-softmax diagonal, finished per tile.
    # Per-element subtraction BEFORE any cross-row reduction (this is the
    # numerics fix: no summing of ~1e6-sized terms prior to cancellation).
    m_r = jnp.max(score, axis=1, keepdims=True)
    s_r = jnp.sum(jnp.exp(score - m_r), axis=1, keepdims=True)
    lp_row = (diag_row - m_r) - jnp.log(s_r)                      # (tq, 1)
    racc_ref[...] += jnp.sum(wrow_ref[...] * lp_row, axis=0, keepdims=True)

    # column-direction ("mol") online log-sum-exp, flash-style accumulation
    m_old = mcol_ref[...]
    m_new = jnp.maximum(m_old, jnp.max(score, axis=0, keepdims=True))
    scol_ref[...] = (scol_ref[...] * jnp.exp(m_old - m_new)
                     + jnp.sum(jnp.exp(score - m_new), axis=0, keepdims=True))
    mcol_ref[...] = m_new

    @pl.when(i == pl.num_programs(0) - 1)
    def _finalize():
        lp_col = (dcol_ref[...] - mcol_ref[...]) - jnp.log(scol_ref[...])
        col_term = jnp.sum(wcol_ref[...] * lp_col, axis=1, keepdims=True)
        total = racc_ref[...] + col_term                          # (1, 1)
        loss_ref[0, 0] = -0.5 * total[0, 0]


def run_loss(eu_p, ev_p, w_u_t, b_u, w_v_t, b_v, bias_p, wrow, wcol, scale, tq):
    n_pad, d = eu_p.shape
    assert bias_p.shape == (n_pad, n_pad) and n_pad % tq == 0
    smem = pl.BlockSpec(memory_space=pltpu.MemorySpace.SMEM)
    grid_spec = pltpu.PrefetchScalarGridSpec(
        num_scalar_prefetch=0,
        grid=(n_pad // tq,),
        in_specs=[
            pl.BlockSpec((tq, d), lambda i: (i, 0)),        # eu row tile
            pl.BlockSpec((n_pad, d), lambda i: (0, 0)),     # ev (resident)
            pl.BlockSpec((d, d), lambda i: (0, 0)),         # WuT
            pl.BlockSpec((1, d), lambda i: (0, 0)),         # bu
            pl.BlockSpec((d, d), lambda i: (0, 0)),         # WvT
            pl.BlockSpec((1, d), lambda i: (0, 0)),         # bv
            pl.BlockSpec((tq, n_pad), lambda i: (i, 0)),    # pre-folded bias tile
            pl.BlockSpec((tq, 1), lambda i: (i, 0)),        # row weights tile
            pl.BlockSpec((1, n_pad), lambda i: (0, 0)),     # col weights
            smem,                                           # exp(logit_scale)
        ],
        out_specs=(
            pl.BlockSpec((tq, n_pad), lambda i: (i, 0)),    # netout tile (lane-dense)
            smem,                                           # scalar loss
        ),
        scratch_shapes=[
            pltpu.VMEM((n_pad, d), jnp.float32),            # x_v (resident)
            pltpu.VMEM((1, n_pad), jnp.float32),            # online col max
            pltpu.VMEM((1, n_pad), jnp.float32),            # online col sum
            pltpu.VMEM((1, n_pad), jnp.float32),            # diag(score) by column
            pltpu.VMEM((1, 1), jnp.float32),                # row-direction accum
        ],
    )
    netout, loss = pl.pallas_call(
        hgnn_loss_kernel,
        out_shape=(jax.ShapeDtypeStruct((n_pad, n_pad), jnp.float32),
                   jax.ShapeDtypeStruct((1, 1), jnp.float32)),
        grid_spec=grid_spec,
        compiler_params=pltpu.CompilerParams(
            dimension_semantics=("arbitrary",),
            vmem_limit_bytes=48 << 20),   # leave headroom under v7x's 64 MiB
    )(eu_p, ev_p, w_u_t, b_u.reshape(1, d), w_v_t, b_v.reshape(1, d),
      bias_p, wrow, wcol, scale)
    return netout, loss


# ----------------------------------------------------------------------------
# HGNN wrapper (parameter setup + embedding gather + padding are plain-JAX glue)
# ----------------------------------------------------------------------------
class HGNNPallas:
    def __init__(self, key, num_users, num_items, embed_dim):
        self.embed_dim = embed_dim
        ks = jax.random.split(key, 6)
        s = 1.0 / np.sqrt(embed_dim)
        # synthetic encoder tables + linear weights (stand-ins for enc_u/enc_v)
        self.u_table = jax.random.normal(ks[0], (num_users, embed_dim), jnp.float32)
        self.v_table = jax.random.normal(ks[1], (num_items, embed_dim), jnp.float32)
        self.w_u = jax.random.uniform(ks[2], (embed_dim, embed_dim), jnp.float32, -s, s)
        self.b_u = jax.random.uniform(ks[3], (embed_dim,), jnp.float32, -s, s)
        self.w_v = jax.random.uniform(ks[4], (embed_dim, embed_dim), jnp.float32, -s, s)
        self.b_v = jax.random.uniform(ks[5], (embed_dim,), jnp.float32, -s, s)
        # weights pre-transposed ONCE so kernels never transpose (MXU-friendly)
        self.w_u_t = jnp.asarray(self.w_u.T)
        self.w_v_t = jnp.asarray(self.w_v.T)
        # HGNN's own parameter actually used in criterion()
        self.logit_scale = jnp.ones((1,), jnp.float32) * np.log(14.0)
        # w_ur1/w_ur2/w_vr1/w_vr2/bn1/bn2 exist in __init__ but are unused in forward()

    def forward(self, nodes_u, nodes_v):
        eu = jnp.take(self.u_table, nodes_u, axis=0)
        ev = jnp.take(self.v_table, nodes_v, axis=0)
        n_u, n_v = eu.shape[0], ev.shape[0]
        pu, pv = _round_up(n_u, 8), _round_up(n_v, 8)
        eu_p = jnp.pad(eu, ((0, pu - n_u), (0, 0)))
        ev_p = jnp.pad(ev, ((0, pv - n_v), (0, 0)))
        xu, xv = run_forward(eu_p, ev_p, self.w_u_t, self.b_u, self.w_v_t, self.b_v)
        return xu[:n_u], xv[:n_v]

    def loss(self, nodes_u, nodes_v, labels):
        n = labels.shape[0]
        assert labels.shape == (n, n)
        assert nodes_u.shape[0] == n and nodes_v.shape[0] == n  # square contrastive score
        n_pad = _round_up(max(n, 1), 128)      # lane-dense netout/bias tiles
        tq = _pick_tq(n_pad)
        eu = jnp.take(self.u_table, nodes_u, axis=0)
        ev = jnp.take(self.v_table, nodes_v, axis=0)
        eu_p = jnp.pad(eu, ((0, n_pad - n), (0, 0)))
        ev_p = jnp.pad(ev, ((0, n_pad - n), (0, 0)))
        # pre-folded additive bias: (labels - I) * -1e6 inside the valid block,
        # -1e30 everywhere padded (suppresses pad rows/cols in both softmaxes)
        bias = (labels.astype(jnp.float32) - jnp.eye(n, dtype=jnp.float32)) * LABEL_BIAS
        bias_p = jnp.full((n_pad, n_pad), NEG_INF_PAD, jnp.float32).at[:n, :n].set(bias)
        # per-row / per-column weights: 1/n on valid entries, 0 on padding
        w = (jnp.arange(n_pad) < n).astype(jnp.float32) / float(n)
        wrow = w.reshape(n_pad, 1)
        wcol = w.reshape(1, n_pad)
        scale = jnp.exp(self.logit_scale).reshape(1, 1)   # .exp().detach() analogue
        netout_p, loss = run_loss(eu_p, ev_p, self.w_u_t, self.b_u,
                                  self.w_v_t, self.b_v, bias_p, wrow, wcol,
                                  scale, tq)
        return loss[0, 0], netout_p[:n, :n]


# ----------------------------------------------------------------------------
# Pure-JAX reference for correctness check
# ----------------------------------------------------------------------------
def reference(model, nodes_u, nodes_v, labels):
    eu = jnp.maximum(jnp.take(model.u_table, nodes_u, 0) @ model.w_u.T + model.b_u, 0.0)
    ev = jnp.maximum(jnp.take(model.v_table, nodes_v, 0) @ model.w_v.T + model.b_v, 0.0)
    netout = eu @ ev.T
    n = netout.shape[0]
    score = (labels - jnp.eye(n)) * LABEL_BIAS + netout * jnp.exp(model.logit_scale[0])
    lp_r = jax.nn.log_softmax(score, axis=-1)
    lp_c = jax.nn.log_softmax(score.T, axis=-1)
    idx = jnp.arange(n)
    loss = 0.5 * (-jnp.mean(lp_r[idx, idx])) + 0.5 * (-jnp.mean(lp_c[idx, idx]))
    return eu, ev, netout, loss


if __name__ == "__main__":
    key = jax.random.PRNGKey(0)
    k_model, k_u, k_v, k_lab = jax.random.split(key, 4)

    num_users, num_items, embed_dim, batch = 20, 24, 128, 8
    model = HGNNPallas(k_model, num_users, num_items, embed_dim)

    nodes_u = jax.random.randint(k_u, (batch,), 0, num_users)
    nodes_v = jax.random.randint(k_v, (batch,), 0, num_items)
    labels = (jax.random.uniform(k_lab, (batch, batch)) > 0.7).astype(jnp.float32)

    # forward (dual-encoder kernel)
    x_u, x_v = model.forward(nodes_u, nodes_v)
    jax.block_until_ready((x_u, x_v))

    # fused, row-tiled encoders + criterion
    loss, netout = model.loss(nodes_u, nodes_v, labels)
    jax.block_until_ready((loss, netout))

    # verify against pure-JAX reference
    eu_ref, ev_ref, netout_ref, loss_ref = reference(model, nodes_u, nodes_v, labels)
    np.testing.assert_allclose(np.asarray(x_u), np.asarray(eu_ref), rtol=1e-5, atol=1e-5)
    np.testing.assert_allclose(np.asarray(x_v), np.asarray(ev_ref), rtol=1e-5, atol=1e-5)
    np.testing.assert_allclose(np.asarray(netout), np.asarray(netout_ref), rtol=1e-4, atol=1e-4)
    np.testing.assert_allclose(float(loss), float(loss_ref), rtol=1e-3, atol=1e-3)

    print("KERNEL_OK")
</pallas_src>

<mosaic_0001>
module attributes {stable_mosaic.version = 11 : i64} {
  func.func @dual_encoder_kernel(%arg0: memref<8x128xf32, #tpu.memory_space<vmem>>, %arg1: memref<8x128xf32, #tpu.memory_space<vmem>>, %arg2: memref<128x128xf32, #tpu.memory_space<vmem>>, %arg3: memref<1x128xf32, #tpu.memory_space<vmem>>, %arg4: memref<128x128xf32, #tpu.memory_space<vmem>>, %arg5: memref<1x128xf32, #tpu.memory_space<vmem>>, %arg6: memref<8x128xf32, #tpu.memory_space<vmem>>, %arg7: memref<8x128xf32, #tpu.memory_space<vmem>>) attributes {dimension_semantics = [], scalar_prefetch = 0 : i64, scratch_operands = 0 : i64, tpu.core_type = #tpu.core_type<tc>} {
    %c0 = arith.constant 0 : index
    %c0_0 = arith.constant 0 : index
    %0 = vector.load %arg0[%c0, %c0_0] : memref<8x128xf32, #tpu.memory_space<vmem>>, vector<8x128xf32>
    %c0_1 = arith.constant 0 : index
    %c0_2 = arith.constant 0 : index
    %1 = vector.load %arg2[%c0_1, %c0_2] : memref<128x128xf32, #tpu.memory_space<vmem>>, vector<128x128xf32>
    %c0_3 = arith.constant 0 : index
    %c0_4 = arith.constant 0 : index
    %2 = vector.load %arg3[%c0_3, %c0_4] : memref<1x128xf32, #tpu.memory_space<vmem>>, vector<1x128xf32>
    %cst = arith.constant dense<0.000000e+00> : vector<8x128xf32>
    %3 = tpu.matmul %0, %1, %cst {dimension_numbers = #tpu.dot_dimension_numbers<[1], [0], [0], [1], [0, 0, 1, 1], [], []>} : vector<8x128xf32>, vector<128x128xf32>, vector<8x128xf32> -> vector<8x128xf32>
    %4 = vector.broadcast %2 : vector<1x128xf32> to vector<8x128xf32>
    %5 = arith.addf %3, %4 : vector<8x128xf32>
    %cst_5 = arith.constant 0.000000e+00 : f32
    %6 = vector.broadcast %cst_5 : f32 to vector<8x128xf32>
    %7 = arith.maximumf %5, %6 : vector<8x128xf32>
    %c0_6 = arith.constant 0 : index
    %c0_7 = arith.constant 0 : index
    %8 = vector.load %arg6[%c0_6, %c0_7] : memref<8x128xf32, #tpu.memory_space<vmem>>, vector<8x128xf32>
    tpu.vector_store %arg6[%c0_6, %c0_7], %7 {strides = array<i32>} : memref<8x128xf32, #tpu.memory_space<vmem>>, vector<8x128xf32>,
    %c0_8 = arith.constant 0 : index
    %c0_9 = arith.constant 0 : index
    %9 = vector.load %arg1[%c0_8, %c0_9] : memref<8x128xf32, #tpu.memory_space<vmem>>, vector<8x128xf32>
    %c0_10 = arith.constant 0 : index
    %c0_11 = arith.constant 0 : index
    %10 = vector.load %arg4[%c0_10, %c0_11] : memref<128x128xf32, #tpu.memory_space<vmem>>, vector<128x128xf32>
    %c0_12 = arith.constant 0 : index
    %c0_13 = arith.constant 0 : index
    %11 = vector.load %arg5[%c0_12, %c0_13] : memref<1x128xf32, #tpu.memory_space<vmem>>, vector<1x128xf32>
    %cst_14 = arith.constant dense<0.000000e+00> : vector<8x128xf32>
    %12 = tpu.matmul %9, %10, %cst_14 {dimension_numbers = #tpu.dot_dimension_numbers<[1], [0], [0], [1], [0, 0, 1, 1], [], []>} : vector<8x128xf32>, vector<128x128xf32>, vector<8x128xf32> -> vector<8x128xf32>
    %13 = vector.broadcast %11 : vector<1x128xf32> to vector<8x128xf32>
    %14 = arith.addf %12, %13 : vector<8x128xf32>
    %cst_15 = arith.constant 0.000000e+00 : f32
    %15 = vector.broadcast %cst_15 : f32 to vector<8x128xf32>
    %16 = arith.maximumf %14, %15 : vector<8x128xf32>
    %c0_16 = arith.constant 0 : index
    %c0_17 = arith.constant 0 : index
    %17 = vector.load %arg7[%c0_16, %c0_17] : memref<8x128xf32, #tpu.memory_space<vmem>>, vector<8x128xf32>
    tpu.vector_store %arg7[%c0_16, %c0_17], %16 {strides = array<i32>} : memref<8x128xf32, #tpu.memory_space<vmem>>, vector<8x128xf32>,
    return
  }
}

</mosaic_0001>

<bundles_post_ra>
// kernel: tpu_custom_call.1
= control target key start
LH: loop header
LB: loop body
LE: loop exit
PB: predicated region body
PF: predicated region fallthrough
CT: control target
= control target key end

     0   :  { %13 = vsyncpa [#allocation3], 0  ;;  %s443_s0 = inlined_call_operand.hbm [shape: f32[8,128], index: 0, kind: input, shape index: {}]   ;;  %s444_s1 = inlined_call_operand.hbm [shape: f32[8,128], index: 1, kind: input, shape index: {}]   ;;  %s445_s2 = inlined_call_operand.hbm [shape: f32[128,128], index: 2, kind: input, shape index: {}]   ;;  %s446_s3 = inlined_call_operand.vmem [shape: f32[1,128], index: 3, kind: input, shape index: {}]   ;;  %s447_s4 = inlined_call_operand.hbm [shape: f32[128,128], index: 4, kind: input, shape index: {}]   ;;  %s448_s5 = inlined_call_operand.vmem [shape: f32[1,128], index: 5, kind: input, shape index: {}]   ;;  %s449_s6 = inlined_call_operand.hbm [shape: f32[8,128], index: 6, kind: output, shape index: {0}]   ;;  %s450_s7 = inlined_call_operand.hbm [shape: f32[8,128], index: 7, kind: output, shape index: {1}]  }
   0x1   :  { %14 = vsyncpa [#allocation6], 0 }
   0x2   :  { %15 = vsyncpa [#allocation9], 0 }
   0x3   :  { %16 = vsyncpa [#allocation4], 0  ;;  %s34_s26 = sshll.u32 %s444_s1, 4  ;;  %s35_s26 = int_to_ptr.hbm [resolvable:$true] %s34_s26 }
   0x4   :  { %17 = vsyncpa [#allocation12], 0  ;;  %s371_s27 = smov [#allocation5]   ;;  %s23_s8 = sshll.u32 %s443_s0, 4  ;;  %s24_s8 = int_to_ptr.hbm [resolvable:$true] %s23_s8 }
   0x5   :  { %s36_s28 = sshll.u32 %s371_s27, 4  ;;  %s372_s9 = smov [#allocation2]   ;;  %s37_s28 = int_to_ptr.vmem [resolvable:$true] %s36_s28 }
   0x6   :  { %39 = dma.hbm_to_vmem [thread:$0]  %s35_s26, 128, %s37_s28, [#allocation6]  }
   0x7   :  { %s25_s10 = sshll.u32 %s372_s9, 4  ;;  %s44_s13 = sshll.u32 %s445_s2, 4  ;;  %s26_s10 = int_to_ptr.vmem [resolvable:$true] %s25_s10  ;;  %s45_s13 = int_to_ptr.hbm [resolvable:$true] %s44_s13 }
   0x8   :  { %28 = dma.hbm_to_vmem [thread:$0]  %s24_s8, 128, %s26_s10, [#allocation3]  }
   0x9   :  { %s373_s1 = smov [#allocation7]   ;;  %s59_s17 = sshll.u32 %s447_s4, 4  ;;  %s60_s17 = int_to_ptr.hbm [resolvable:$true] %s59_s17 }
   0xa   :  { %s46_s14 = sshll.u32 %s373_s1, 4  ;;  %s374_s18 = smov 128   ;;  %s47_s14 = int_to_ptr.vmem [resolvable:$true] %s46_s14 }
   0xb   :  { %s375_s0 = smov 8   ;;  %s376_s19 = smov [#allocation8]  }
   0xc   :  { %52 = dma.hbm_to_vmem [thread:$0]  %s45_s13, 2048, %s47_s14, [#allocation6], %s374_s18, %s374_s18, %s375_s0  }
   0xd   :  { %s61_s20 = sshll.u32 %s376_s19, 4  ;;  %s62_s20 = int_to_ptr.vmem [resolvable:$true] %s61_s20 }
   0xe   :  { %67 = dma.hbm_to_vmem [thread:$0]  %s60_s17, 2048, %s62_s20, [#allocation9], %s374_s18, %s374_s18, %s375_s0  }
   0xf   :  { %361 = dma.done.wait [#allocation3], 128  }
  0x10   :  { %362 = vsyncadd [#allocation3], 4294967168 }
  0x11   :  { %363 = dma.done.wait [#allocation6], 2176  }
  0x12   :  { %364 = vsyncadd [#allocation6], 4294965120 }
  0x13   :  { %365 = dma.done.wait [#allocation9], 2048  }
  0x14   :  { %366 = vsyncadd [#allocation9], 4294965248  ;;  %v102_v0 = vld [vmem:[#allocation7 + $0x78] sm:$0xff]  ;;  %v101_v2 = vld [vmem:[#allocation7 + $0x70] sm:$0xff]  ;;  %s377_s23 = smov [#allocation10]   ;;  %s179_s27 = sshll.u32 %s449_s6, 4  ;;  %s180_s27 = int_to_ptr.hbm [resolvable:$true] %s179_s27 }
  0x15   :  { %v145_v1 = vld [vmem:[#allocation8 + $0x78] sm:$0xff]  ;;  %107 = vmatpush.msra.mxu0 %v102_v0  ;;  %v144_v3 = vld [vmem:[#allocation8 + $0x70] sm:$0xff]  ;;  %v100_v4 = vld [vmem:[#allocation7 + $0x68] sm:$0xff]  ;;  %s177_s24 = sshll.u32 %s377_s23, 4  ;;  %s378_s28 = smov [#allocation11]   ;;  %s178_s24 = int_to_ptr.vmem [resolvable:$true] %s177_s24 }
  0x16   :  { %150 = vmatpush.msra.mxu1 %v145_v1  ;;  %v143_v5 = vld [vmem:[#allocation8 + $0x68] sm:$0xff]  ;;  %v99_v6 = vld [vmem:[#allocation7 + $0x60] sm:$0xff]  ;;  %v98_v8 = vld [vmem:[#allocation7 + $0x58] sm:$0xff]  ;;  %s188_s29 = sshll.u32 %s378_s28, 4  ;;  %s189_s29 = int_to_ptr.vmem [resolvable:$true] %s188_s29 }
  0x17   :  { %108 = vmatpush.msra.mxu0 %v101_v2  ;;  %v142_v7 = vld [vmem:[#allocation8 + $0x60] sm:$0xff]  ;;  %v141_v9 = vld [vmem:[#allocation8 + $0x58] sm:$0xff]  ;;  %v97_v10 = vld [vmem:[#allocation7 + $0x50] sm:$0xff] }
  0x18   :  { %151 = vmatpush.msra.mxu1 %v144_v3  ;;  %v140_v11 = vld [vmem:[#allocation8 + $0x50] sm:$0xff]  ;;  %v96_v12 = vld [vmem:[#allocation7 + $0x48] sm:$0xff]  ;;  %v95_v14 = vld [vmem:[#allocation7 + $0x40] sm:$0xff] }
  0x19   :  { %109 = vmatpush.msra.mxu0 %v100_v4  ;;  %v139_v13 = vld [vmem:[#allocation8 + $0x48] sm:$0xff]  ;;  %v138_v15 = vld [vmem:[#allocation8 + $0x40] sm:$0xff]  ;;  %v94_v16 = vld [vmem:[#allocation7 + $0x38] sm:$0xff] }
  0x1a   :  { %152 = vmatpush.msra.mxu1 %v143_v5  ;;  %v137_v17 = vld [vmem:[#allocation8 + $0x38] sm:$0xff]  ;;  %v93_v18 = vld [vmem:[#allocation7 + $0x30] sm:$0xff]  ;;  %v92_v20 = vld [vmem:[#allocation7 + $0x28] sm:$0xff] }
  0x1b   :  { %110 = vmatpush.msra.mxu0 %v99_v6  ;;  %v136_v19 = vld [vmem:[#allocation8 + $0x30] sm:$0xff]  ;;  %v135_v21 = vld [vmem:[#allocation8 + $0x28] sm:$0xff]  ;;  %v91_v22 = vld [vmem:[#allocation7 + $0x20] sm:$0xff] }
  0x1c   :  { %153 = vmatpush.msra.mxu1 %v142_v7  ;;  %v134_v23 = vld [vmem:[#allocation8 + $0x20] sm:$0xff]  ;;  %v90_v24 = vld [vmem:[#allocation7 + $0x18] sm:$0xff]  ;;  %v89_v26 = vld [vmem:[#allocation7 + $0x10] sm:$0xff] }
  0x1d   :  { %111 = vmatpush.msra.mxu0 %v98_v8  ;;  %v133_v25 = vld [vmem:[#allocation8 + $0x18] sm:$0xff]  ;;  %v132_v27 = vld [vmem:[#allocation8 + $0x10] sm:$0xff]  ;;  %v88_v28 = vld [vmem:[#allocation7 + $0x8] sm:$0xff] }
  0x1e   :  { %154 = vmatpush.msra.mxu1 %v141_v9  ;;  %v131_v29 = vld [vmem:[#allocation8 + $0x8] sm:$0xff]  ;;  %v87_v30 = vld [vmem:[#allocation7] sm:$0xff]  ;;  %v86_v32 = vld [vmem:[#allocation2] sm:$0xff] }
  0x1f   :  { %112 = vmatpush.msra.mxu0 %v97_v10  ;;  %v130_v31 = vld [vmem:[#allocation8] sm:$0xff]  ;;  %v129_v33 = vld [vmem:[#allocation5] sm:$0xff]  ;;  %v215_v34 = vld [vmem:[%s446_s3] ss:$0 sm:$0xff]  ;;  %s190_s3 = sshll.u32 %s450_s7, 4  ;;  %s191_s3 = int_to_ptr.hbm [resolvable:$true] %s190_s3 }
  0x20   :  { %155 = vmatpush.msra.mxu1 %v140_v11  ;;  %v216_v35 = vld [vmem:[%s448_s5] ss:$0 sm:$0xff] }
  0x21   :  { %113 = vmatpush.msra.mxu0 %v96_v12 }
  0x22   :  { %156 = vmatpush.msra.mxu1 %v139_v13 }
  0x23   :  { %114 = vmatpush.msra.mxu0 %v95_v14 }
  0x24   :  { %157 = vmatpush.msra.mxu1 %v138_v15 }
  0x25   :  { %115 = vmatpush.msra.mxu0 %v94_v16 }
  0x26   :  { %158 = vmatpush.msra.mxu1 %v137_v17 }
  0x27   :  { %116 = vmatpush.msra.mxu0 %v93_v18 }
  0x28   :  { %159 = vmatpush.msra.mxu1 %v136_v19 }
  0x29   :  { %117 = vmatpush.msra.mxu0 %v92_v20 }
  0x2a   :  { %160 = vmatpush.msra.mxu1 %v135_v21 }
  0x2b   :  { %118 = vmatpush.msra.mxu0 %v91_v22 }
  0x2c   :  { %161 = vmatpush.msra.mxu1 %v134_v23 }
  0x2d   :  { %119 = vmatpush.msra.mxu0 %v90_v24 }
  0x2e   :  { %162 = vmatpush.msra.mxu1 %v133_v25 }
  0x2f   :  { %120 = vmatpush.msra.mxu0 %v89_v26 }
  0x30   :  { %163 = vmatpush.msra.mxu1 %v132_v27 }
  0x31   :  { %121 = vmatpush.msra.mxu0 %v88_v28 }
  0x32   :  { %164 = vmatpush.msra.mxu1 %v131_v29 }
  0x33   :  { %122 = vmatpush.msra.mxu0 %v87_v30 }
  0x34   :  { %165 = vmatpush.msra.mxu1 %v130_v31  ;;  %123 = vmatmul.f32.vlgmr.msra.gmra.mxu0 %v86_v32 }
  0x35   :  { %166 = vmatmul.f32.vlgmr.msra.gmra.mxu1 %v129_v33 }
  0xb1   :  { %v124_v36 = vpop.f32.mrf.mxu0 }
  0xb2   :  { %v167_v37 = vpop.f32.mrf.mxu1  ;;  %v125_v38 = vadd.f32 %v215_v34, %v124_v36 }
  0xb3   :  { %v168_v39 = vadd.f32 %v216_v35, %v167_v37 }
  0xb4   :  { %v127_v40 = vmax.f32 %v125_v38, 0.0 }
  0xb5   :  { %v170_v41 = vmax.f32 %v168_v39, 0.0 }
  0xb6   :  { %128 = vst [vmem:[#allocation10] sm:$0xff] %v127_v40 }
  0xb7   :  { %171 = vst [vmem:[#allocation11] sm:$0xff] %v170_v41  ;;  %182 = dma.vmem_to_hbm [thread:$0]  %s178_s24, 128, %s180_s27, [#allocation4]  }
  0xb8   :  { %193 = dma.vmem_to_hbm [thread:$0]  %s189_s29, 128, %s191_s3, [#allocation12]  }
  0xb9   :  { %367 = dma.done.wait [#allocation4], 128  }
  0xba   :  { %368 = vsyncadd [#allocation4], 4294967168 }
  0xbb   :  { %369 = dma.done.wait [#allocation12], 128  }
  0xbc   :  { %370 = vsyncadd [#allocation12], 4294967168 }
  0xbd   :  { %202 = vsyncpa [#allocation3], 1 }
  0xbe   :  { %203 = vsyncpa [#allocation6], 1 }
  0xbf   :  { %204 = vsyncpa [#allocation9], 1 }
  0xc0   :  { %205 = vsyncpa [#allocation4], 1 }
  0xc1   :  { %206 = vsyncpa [#allocation12], 1 }

</bundles_post_ra>
